<compile_context>
chip_gen: v7x
topology: tpu7x:2x2x1
jax: 0.10.0
libtpu: 0.0.40
codegen_flags: <defaults>
</compile_context>

<pallas_src>
import jax
import jax.numpy as jnp
from jax.experimental import pallas as pl
from jax.experimental.pallas import tpu as pltpu

IN_PAD = 128    # input features padded 9 -> 128 (lane-dense loads)
H4_PAD = 128    # fc4 output padded 64 -> 128 (lane-dense intermediates)
OUT_PAD = 128   # output features padded 9 -> 128 (lane-dense stores)


def _round_up(n, m):
    return ((n + m - 1) // m) * m


def dqn2_kernel(x_ref,
                w1_ref, b1_ref,
                w2_ref, b2_ref,
                w3_ref, b3_ref,
                w4_ref, b4_ref,
                w5_ref, b5_ref,
                o_ref):
    bf16 = jnp.bfloat16
    # fc1 + relu  (bf16 operands into the MXU, f32 accumulation)
    h = jnp.dot(x_ref[...], w1_ref[...], preferred_element_type=jnp.float32)
    h = jnp.maximum(h + b1_ref[...], 0.0)
    # dropout -> identity (eval semantics)
    # fc2 + relu
    h = jnp.dot(h.astype(bf16), w2_ref[...],
                preferred_element_type=jnp.float32)
    h = jnp.maximum(h + b2_ref[...], 0.0)
    # fc3 + relu
    h = jnp.dot(h.astype(bf16), w3_ref[...],
                preferred_element_type=jnp.float32)
    h = jnp.maximum(h + b3_ref[...], 0.0)
    # dropout -> identity (eval semantics)
    # fc4 + relu  (output zero-padded 64 -> 128; pad cols stay exactly 0)
    h = jnp.dot(h.astype(bf16), w4_ref[...],
                preferred_element_type=jnp.float32)
    h = jnp.maximum(h + b4_ref[...], 0.0)
    # fc5 (no activation), lane-dense (TB, 128) store
    o = jnp.dot(h.astype(bf16), w5_ref[...],
                preferred_element_type=jnp.float32)
    o_ref[...] = o + b5_ref[...]


def dqn2_forward(x, params, *, tb=256):
    """x: (B, 9) f32.  params: [(w_t, b), ...] with w_t (in, out) f32, b (1, out) f32."""
    B = x.shape[0]

    # Clamp the batch tile so tiny batches don't waste MXU work on pad rows.
    tb_eff = _round_up(min(tb, _round_up(B, 8)), 8)
    n_tiles = pl.cdiv(B, tb_eff)
    b_pad = n_tiles * tb_eff

    # Lane-dense, zero-padded, bf16 input: (B_pad, 128).
    x_p = jnp.zeros((b_pad, IN_PAD), jnp.bfloat16).at[:B, :9].set(
        x.astype(jnp.bfloat16))

    (w1, b1), (w2, b2), (w3, b3), (w4, b4), (w5, b5) = params
    # Pad fc1 input dim 9 -> 128 (zero rows meet the zero-padded x cols),
    # pad fc4 output dim 64 -> 128 and fc5 output dim 9 -> 128 (zero cols +
    # zero bias, and zero rows into fc5).  Weights to bf16, biases stay f32.
    w1p = jnp.zeros((IN_PAD, 256), jnp.float32).at[:9, :].set(w1).astype(jnp.bfloat16)
    w2p = w2.astype(jnp.bfloat16)
    w3p = w3.astype(jnp.bfloat16)
    w4p = jnp.zeros((128, H4_PAD), jnp.float32).at[:, :64].set(w4).astype(jnp.bfloat16)
    b4p = jnp.zeros((1, H4_PAD), jnp.float32).at[:, :64].set(b4)
    w5p = jnp.zeros((H4_PAD, OUT_PAD), jnp.float32).at[:64, :9].set(w5).astype(jnp.bfloat16)
    b5p = jnp.zeros((1, OUT_PAD), jnp.float32).at[:, :9].set(b5)

    weights_and_biases = [w1p, b1, w2p, b2, w3p, b3, w4p, b4p, w5p, b5p]

    def resident_spec(a):
        # Full array as a single block, same block index every grid step ->
        # DMA'd once, stays VMEM-resident across batch tiles.
        return pl.BlockSpec(a.shape, lambda i: (0, 0))

    x_spec = pl.BlockSpec((tb_eff, IN_PAD), lambda i: (i, 0))
    o_spec = pl.BlockSpec((tb_eff, OUT_PAD), lambda i: (i, 0))

    out = pl.pallas_call(
        dqn2_kernel,
        out_shape=jax.ShapeDtypeStruct((b_pad, OUT_PAD), jnp.float32),
        grid_spec=pltpu.PrefetchScalarGridSpec(
            num_scalar_prefetch=0,
            grid=(n_tiles,),
            in_specs=[x_spec] + [resident_spec(a) for a in weights_and_biases],
            out_specs=o_spec,
        ),
        compiler_params=pltpu.CompilerParams(
            dimension_semantics=("parallel",)),
    )(x_p, *weights_and_biases)

    return out[:B, :9]


def init_params(key):
    """Deterministic synthetic init mimicking nn.Linear shapes.
    Returns [(w_t, b), ...] with w_t = (in, out) (i.e. PyTorch weight.T), f32."""
    dims = [(9, 256), (256, 128), (128, 128), (128, 64), (64, 9)]
    params = []
    for (fan_in, fan_out) in dims:
        key, kw, kb = jax.random.split(key, 3)
        bound = 1.0 / jnp.sqrt(jnp.float32(fan_in))
        w_t = jax.random.uniform(kw, (fan_in, fan_out), jnp.float32,
                                 minval=-bound, maxval=bound)
        b = jax.random.uniform(kb, (1, fan_out), jnp.float32,
                               minval=-bound, maxval=bound)
        params.append((w_t, b))
    return params


def reference_forward(x, params):
    """Pure-JAX reference emulating the kernel's bf16-operand / f32-accum math."""
    h = x
    for i, (w_t, b) in enumerate(params):
        h = jnp.dot(h.astype(jnp.bfloat16), w_t.astype(jnp.bfloat16),
                    preferred_element_type=jnp.float32) + b
        if i < len(params) - 1:
            h = jnp.maximum(h, 0.0)
    return h


if __name__ == "__main__":
    key = jax.random.PRNGKey(0)
    kx, kp = jax.random.split(key)
    B = 8
    x = jax.random.normal(kx, (B, 9), jnp.float32)
    params = init_params(kp)

    out = dqn2_forward(x, params, tb=256)
    out = jax.block_until_ready(out)

    ref = reference_forward(x, params)
    assert out.shape == (B, 9)
    assert jnp.allclose(out, ref, atol=1e-2, rtol=1e-2), (
        float(jnp.max(jnp.abs(out - ref))))

    print("KERNEL_OK")
</pallas_src>

<mosaic_0001>
module attributes {stable_mosaic.version = 11 : i64} {
  func.func @dqn2_kernel(%arg0: i32, %arg1: memref<8x128xbf16, #tpu.memory_space<vmem>>, %arg2: memref<128x256xbf16, #tpu.memory_space<vmem>>, %arg3: memref<1x256xf32, #tpu.memory_space<vmem>>, %arg4: memref<256x128xbf16, #tpu.memory_space<vmem>>, %arg5: memref<1x128xf32, #tpu.memory_space<vmem>>, %arg6: memref<128x128xbf16, #tpu.memory_space<vmem>>, %arg7: memref<1x128xf32, #tpu.memory_space<vmem>>, %arg8: memref<128x128xbf16, #tpu.memory_space<vmem>>, %arg9: memref<1x128xf32, #tpu.memory_space<vmem>>, %arg10: memref<128x128xbf16, #tpu.memory_space<vmem>>, %arg11: memref<1x128xf32, #tpu.memory_space<vmem>>, %arg12: memref<8x128xf32, #tpu.memory_space<vmem>>) attributes {dimension_semantics = [#tpu.dimension_semantics<parallel>], iteration_bounds = array<i64: 1>, scalar_prefetch = 0 : i64, scratch_operands = 0 : i64, tpu.core_type = #tpu.core_type<tc>, window_params = [{transform_indices = @transform_0, window_bounds = array<i64: 8, 128>}, {pipeline_mode = #tpu.pipeline_mode<synchronous>, transform_indices = @transform_1, window_bounds = array<i64: 128, 256>}, {pipeline_mode = #tpu.pipeline_mode<synchronous>, transform_indices = @transform_2, window_bounds = array<i64: 1, 256>}, {pipeline_mode = #tpu.pipeline_mode<synchronous>, transform_indices = @transform_3, window_bounds = array<i64: 256, 128>}, {pipeline_mode = #tpu.pipeline_mode<synchronous>, transform_indices = @transform_4, window_bounds = array<i64: 1, 128>}, {pipeline_mode = #tpu.pipeline_mode<synchronous>, transform_indices = @transform_5, window_bounds = array<i64: 128, 128>}, {pipeline_mode = #tpu.pipeline_mode<synchronous>, transform_indices = @transform_6, window_bounds = array<i64: 1, 128>}, {pipeline_mode = #tpu.pipeline_mode<synchronous>, transform_indices = @transform_7, window_bounds = array<i64: 128, 128>}, {pipeline_mode = #tpu.pipeline_mode<synchronous>, transform_indices = @transform_8, window_bounds = array<i64: 1, 128>}, {pipeline_mode = #tpu.pipeline_mode<synchronous>, transform_indices = @transform_9, window_bounds = array<i64: 128, 128>}, {pipeline_mode = #tpu.pipeline_mode<synchronous>, transform_indices = @transform_10, window_bounds = array<i64: 1, 128>}, {transform_indices = @transform_11, window_bounds = array<i64: 8, 128>}]} {
    %c0 = arith.constant 0 : index
    %c0_0 = arith.constant 0 : index
    %0 = vector.load %arg1[%c0, %c0_0] : memref<8x128xbf16, #tpu.memory_space<vmem>>, vector<8x128xbf16>
    %c0_1 = arith.constant 0 : index
    %c0_2 = arith.constant 0 : index
    %1 = vector.load %arg2[%c0_1, %c0_2] : memref<128x256xbf16, #tpu.memory_space<vmem>>, vector<128x256xbf16>
    %cst = arith.constant dense<0.000000e+00> : vector<8x256xf32>
    %2 = tpu.matmul %0, %1, %cst {dimension_numbers = #tpu.dot_dimension_numbers<[1], [0], [0], [1], [0, 0, 1, 1], [], []>} : vector<8x128xbf16>, vector<128x256xbf16>, vector<8x256xf32> -> vector<8x256xf32>
    %c0_3 = arith.constant 0 : index
    %c0_4 = arith.constant 0 : index
    %3 = vector.load %arg3[%c0_3, %c0_4] : memref<1x256xf32, #tpu.memory_space<vmem>>, vector<1x256xf32>
    %4 = vector.broadcast %3 : vector<1x256xf32> to vector<8x256xf32>
    %5 = arith.addf %2, %4 : vector<8x256xf32>
    %cst_5 = arith.constant 0.000000e+00 : f32
    %6 = vector.broadcast %cst_5 : f32 to vector<8x256xf32>
    %7 = arith.maximumf %5, %6 : vector<8x256xf32>
    %8 = arith.truncf %7 : vector<8x256xf32> to vector<8x256xbf16>
    %c0_6 = arith.constant 0 : index
    %c0_7 = arith.constant 0 : index
    %9 = vector.load %arg4[%c0_6, %c0_7] : memref<256x128xbf16, #tpu.memory_space<vmem>>, vector<256x128xbf16>
    %cst_8 = arith.constant dense<0.000000e+00> : vector<8x128xf32>
    %10 = tpu.matmul %8, %9, %cst_8 {dimension_numbers = #tpu.dot_dimension_numbers<[1], [0], [0], [1], [0, 0, 1, 1], [], []>} : vector<8x256xbf16>, vector<256x128xbf16>, vector<8x128xf32> -> vector<8x128xf32>
    %c0_9 = arith.constant 0 : index
    %c0_10 = arith.constant 0 : index
    %11 = vector.load %arg5[%c0_9, %c0_10] : memref<1x128xf32, #tpu.memory_space<vmem>>, vector<1x128xf32>
    %12 = vector.broadcast %11 : vector<1x128xf32> to vector<8x128xf32>
    %13 = arith.addf %10, %12 : vector<8x128xf32>
    %cst_11 = arith.constant 0.000000e+00 : f32
    %14 = vector.broadcast %cst_11 : f32 to vector<8x128xf32>
    %15 = arith.maximumf %13, %14 : vector<8x128xf32>
    %16 = arith.truncf %15 : vector<8x128xf32> to vector<8x128xbf16>
    %c0_12 = arith.constant 0 : index
    %c0_13 = arith.constant 0 : index
    %17 = vector.load %arg6[%c0_12, %c0_13] : memref<128x128xbf16, #tpu.memory_space<vmem>>, vector<128x128xbf16>
    %cst_14 = arith.constant dense<0.000000e+00> : vector<8x128xf32>
    %18 = tpu.matmul %16, %17, %cst_14 {dimension_numbers = #tpu.dot_dimension_numbers<[1], [0], [0], [1], [0, 0, 1, 1], [], []>} : vector<8x128xbf16>, vector<128x128xbf16>, vector<8x128xf32> -> vector<8x128xf32>
    %c0_15 = arith.constant 0 : index
    %c0_16 = arith.constant 0 : index
    %19 = vector.load %arg7[%c0_15, %c0_16] : memref<1x128xf32, #tpu.memory_space<vmem>>, vector<1x128xf32>
    %20 = vector.broadcast %19 : vector<1x128xf32> to vector<8x128xf32>
    %21 = arith.addf %18, %20 : vector<8x128xf32>
    %cst_17 = arith.constant 0.000000e+00 : f32
    %22 = vector.broadcast %cst_17 : f32 to vector<8x128xf32>
    %23 = arith.maximumf %21, %22 : vector<8x128xf32>
    %24 = arith.truncf %23 : vector<8x128xf32> to vector<8x128xbf16>
    %c0_18 = arith.constant 0 : index
    %c0_19 = arith.constant 0 : index
    %25 = vector.load %arg8[%c0_18, %c0_19] : memref<128x128xbf16, #tpu.memory_space<vmem>>, vector<128x128xbf16>
    %cst_20 = arith.constant dense<0.000000e+00> : vector<8x128xf32>
    %26 = tpu.matmul %24, %25, %cst_20 {dimension_numbers = #tpu.dot_dimension_numbers<[1], [0], [0], [1], [0, 0, 1, 1], [], []>} : vector<8x128xbf16>, vector<128x128xbf16>, vector<8x128xf32> -> vector<8x128xf32>
    %c0_21 = arith.constant 0 : index
    %c0_22 = arith.constant 0 : index
    %27 = vector.load %arg9[%c0_21, %c0_22] : memref<1x128xf32, #tpu.memory_space<vmem>>, vector<1x128xf32>
    %28 = vector.broadcast %27 : vector<1x128xf32> to vector<8x128xf32>
    %29 = arith.addf %26, %28 : vector<8x128xf32>
    %cst_23 = arith.constant 0.000000e+00 : f32
    %30 = vector.broadcast %cst_23 : f32 to vector<8x128xf32>
    %31 = arith.maximumf %29, %30 : vector<8x128xf32>
    %32 = arith.truncf %31 : vector<8x128xf32> to vector<8x128xbf16>
    %c0_24 = arith.constant 0 : index
    %c0_25 = arith.constant 0 : index
    %33 = vector.load %arg10[%c0_24, %c0_25] : memref<128x128xbf16, #tpu.memory_space<vmem>>, vector<128x128xbf16>
    %cst_26 = arith.constant dense<0.000000e+00> : vector<8x128xf32>
    %34 = tpu.matmul %32, %33, %cst_26 {dimension_numbers = #tpu.dot_dimension_numbers<[1], [0], [0], [1], [0, 0, 1, 1], [], []>} : vector<8x128xbf16>, vector<128x128xbf16>, vector<8x128xf32> -> vector<8x128xf32>
    %c0_27 = arith.constant 0 : index
    %c0_28 = arith.constant 0 : index
    %35 = vector.load %arg11[%c0_27, %c0_28] : memref<1x128xf32, #tpu.memory_space<vmem>>, vector<1x128xf32>
    %36 = vector.broadcast %35 : vector<1x128xf32> to vector<8x128xf32>
    %37 = arith.addf %34, %36 : vector<8x128xf32>
    %c0_29 = arith.constant 0 : index
    %c0_30 = arith.constant 0 : index
    %38 = vector.load %arg12[%c0_29, %c0_30] : memref<8x128xf32, #tpu.memory_space<vmem>>, vector<8x128xf32>
    tpu.vector_store %arg12[%c0_29, %c0_30], %37 {strides = array<i32>} : memref<8x128xf32, #tpu.memory_space<vmem>>, vector<8x128xf32>,
    return
  }
  func.func @transform_0(%arg0: i32) -> (i32, i32) {
    %c0_i32 = arith.constant 0 : i32
    %c0_i32_0 = arith.constant 0 : i32
    return %arg0, %c0_i32 : i32, i32
  }
  func.func @transform_1(%arg0: i32) -> (i32, i32) {
    %c0_i32 = arith.constant 0 : i32
    %c0_i32_0 = arith.constant 0 : i32
    %c0_i32_1 = arith.constant 0 : i32
    return %c0_i32, %c0_i32_0 : i32, i32
  }
  func.func @transform_2(%arg0: i32) -> (i32, i32) {
    %c0_i32 = arith.constant 0 : i32
    %c0_i32_0 = arith.constant 0 : i32
    %c0_i32_1 = arith.constant 0 : i32
    return %c0_i32, %c0_i32_0 : i32, i32
  }
  func.func @transform_3(%arg0: i32) -> (i32, i32) {
    %c0_i32 = arith.constant 0 : i32
    %c0_i32_0 = arith.constant 0 : i32
    %c0_i32_1 = arith.constant 0 : i32
    return %c0_i32, %c0_i32_0 : i32, i32
  }
  func.func @transform_4(%arg0: i32) -> (i32, i32) {
    %c0_i32 = arith.constant 0 : i32
    %c0_i32_0 = arith.constant 0 : i32
    %c0_i32_1 = arith.constant 0 : i32
    return %c0_i32, %c0_i32_0 : i32, i32
  }
  func.func @transform_5(%arg0: i32) -> (i32, i32) {
    %c0_i32 = arith.constant 0 : i32
    %c0_i32_0 = arith.constant 0 : i32
    %c0_i32_1 = arith.constant 0 : i32
    return %c0_i32, %c0_i32_0 : i32, i32
  }
  func.func @transform_6(%arg0: i32) -> (i32, i32) {
    %c0_i32 = arith.constant 0 : i32
    %c0_i32_0 = arith.constant 0 : i32
    %c0_i32_1 = arith.constant 0 : i32
    return %c0_i32, %c0_i32_0 : i32, i32
  }
  func.func @transform_7(%arg0: i32) -> (i32, i32) {
    %c0_i32 = arith.constant 0 : i32
    %c0_i32_0 = arith.constant 0 : i32
    %c0_i32_1 = arith.constant 0 : i32
    return %c0_i32, %c0_i32_0 : i32, i32
  }
  func.func @transform_8(%arg0: i32) -> (i32, i32) {
    %c0_i32 = arith.constant 0 : i32
    %c0_i32_0 = arith.constant 0 : i32
    %c0_i32_1 = arith.constant 0 : i32
    return %c0_i32, %c0_i32_0 : i32, i32
  }
  func.func @transform_9(%arg0: i32) -> (i32, i32) {
    %c0_i32 = arith.constant 0 : i32
    %c0_i32_0 = arith.constant 0 : i32
    %c0_i32_1 = arith.constant 0 : i32
    return %c0_i32, %c0_i32_0 : i32, i32
  }
  func.func @transform_10(%arg0: i32) -> (i32, i32) {
    %c0_i32 = arith.constant 0 : i32
    %c0_i32_0 = arith.constant 0 : i32
    %c0_i32_1 = arith.constant 0 : i32
    return %c0_i32, %c0_i32_0 : i32, i32
  }
  func.func @transform_11(%arg0: i32) -> (i32, i32) {
    %c0_i32 = arith.constant 0 : i32
    %c0_i32_0 = arith.constant 0 : i32
    return %arg0, %c0_i32 : i32, i32
  }
}

</mosaic_0001>

<bundles_post_ra>
// kernel: tpu_custom_call.1
= control target key start
LH: loop header
LB: loop body
LE: loop exit
PB: predicated region body
PF: predicated region fallthrough
CT: control target
= control target key end

     0   :  { %16 = vsyncpa [#allocation3], 0  ;;  %s1433_s0 = inlined_call_operand.hbm [shape: bf16[8,128], index: 0, kind: input, shape index: {}]   ;;  %s1434_s1 = inlined_call_operand.hbm [shape: bf16[128,256], index: 1, kind: input, shape index: {}]   ;;  %s1435_s2 = inlined_call_operand.vmem [shape: f32[1,256], index: 2, kind: input, shape index: {}]   ;;  %s1436_s3 = inlined_call_operand.hbm [shape: bf16[256,128], index: 3, kind: input, shape index: {}]   ;;  %s1437_s4 = inlined_call_operand.vmem [shape: f32[1,128], index: 4, kind: input, shape index: {}]   ;;  %s1438_s5 = inlined_call_operand.hbm [shape: bf16[128,128], index: 5, kind: input, shape index: {}]   ;;  %s1439_s6 = inlined_call_operand.vmem [shape: f32[1,128], index: 6, kind: input, shape index: {}]   ;;  %s1440_s7 = inlined_call_operand.hbm [shape: bf16[128,128], index: 7, kind: input, shape index: {}]   ;;  %s1441_s8 = inlined_call_operand.vmem [shape: f32[1,128], index: 8, kind: input, shape index: {}]   ;;  %s1442_s9 = inlined_call_operand.hbm [shape: bf16[128,128], index: 9, kind: input, shape index: {}]   ;;  %s1443_s10 = inlined_call_operand.vmem [shape: f32[1,128], index: 10, kind: input, shape index: {}]   ;;  %s1444_s11 = inlined_call_operand.hbm [shape: f32[8,128], index: 11, kind: output, shape index: {}]  }
   0x1   :  { %17 = vsyncpa [#allocation6], 0 }
   0x2   :  { %18 = vsyncpa [#allocation9], 0 }
   0x3   :  { %19 = vsyncpa [#allocation12], 0 }
   0x4   :  { %20 = vsyncpa [#allocation4], 0  ;;  %s1218_s17 = smov [#allocation5]   ;;  %s1054_s21 = scalar_lea.hbm %s1434_s1, 2048 }
   0x5   :  { %s36_s18 = sshll.u32 %s1218_s17, 4  ;;  %p1055_p0 = scmp.ne.s32.totalorder %s1434_s1, %s1054_s21  ;;  %s37_s18 = int_to_ptr.vmem [resolvable:$true] %s36_s18 }
   0x6   :  { %p1058_p1 = scmp.lt.u32.totalorder %s1054_s21, %s1434_s1 }
   0x8   :  { %p1060_p2 = pnand %p1058_p1, %p1055_p0 }
   0xa   :  { %1063 = shalt.err (!%p1060_p2)
}
   0xb   :  { %s1064_s26 = scalar_lea.vmem %s37_s18, 2048  ;;  %p1069_p4 = scmp.lt.s32.totalorder %s37_s18, %s37_s18 }
   0xc   :  { %p1065_p3 = scmp.ne.s32.totalorder %s37_s18, %s1064_s26  ;;  %p1070_p5 = scmp.lt.s32.totalorder %s1064_s26, %s1064_s26 }
   0xe   :  { %p1071_p6 = por %p1070_p5, %p1069_p4 }
  0x10   :  { %p1072_p7 = pnand %p1071_p6, %p1065_p3 }
  0x12   :  { %1075 = shalt.err (!%p1072_p7)
}
  0x13   :  { %s1219_s27 = smov 128   ;;  %s1220_s28 = smov 8  }
  0x14   :  { %42 = dma.hbm_to_vmem [thread:$0]  %s1434_s1, 2048, %s37_s18, [#allocation6], %s1219_s27, %s1219_s27, %s1220_s28  }
  0x15   :  { %s1221_s12 = smov [#allocation8]   ;;  %s1222_s14 = smov [#allocation2]  }
  0x16   :  { %s64_s13 = sshll.u32 %s1221_s12, 4  ;;  %s27_s15 = sshll.u32 %s1222_s14, 4  ;;  %s65_s13 = int_to_ptr.vmem [resolvable:$true] %s64_s13  ;;  %s28_s15 = int_to_ptr.vmem [resolvable:$true] %s27_s15 }
  0x17   :  { %s1076_s19 = scalar_lea.hbm %s1438_s5, 1024 }
  0x18   :  { %p1077_p8 = scmp.ne.s32.totalorder %s1438_s5, %s1076_s19  ;;  %p1080_p9 = scmp.lt.u32.totalorder %s1076_s19, %s1438_s5 }
  0x1a   :  { %p1082_p10 = pnand %p1080_p9, %p1077_p8 }
  0x1c   :  { %1085 = shalt.err (!%p1082_p10)
}
  0x1d   :  { %s1086_s1 = scalar_lea.vmem %s65_s13, 1024  ;;  %p1091_p12 = scmp.lt.s32.totalorder %s65_s13, %s65_s13 }
  0x1e   :  { %p1087_p11 = scmp.ne.s32.totalorder %s65_s13, %s1086_s1  ;;  %p1092_p13 = scmp.lt.s32.totalorder %s1086_s1, %s1086_s1 }
  0x20   :  { %p1093_p0 = por %p1092_p13, %p1091_p12 }
  0x22   :  { %p1094_p1 = pnand %p1093_p0, %p1087_p11 }
  0x24   :  { %1097 = shalt.err (!%p1094_p1)
}
  0x25   :  { %s1223_s18 = smov 64   ;;  %s1224_s24 = smov 4  }
  0x26   :  { %70 = dma.hbm_to_vmem [thread:$0]  %s1438_s5, 1024, %s65_s13, [#allocation9], %s1223_s18, %s1223_s18, %s1224_s24  }
  0x27   :  { %s1098_s29 = scalar_lea.hbm %s1433_s0, 64 }
  0x28   :  { %p1099_p2 = scmp.ne.s32.totalorder %s1433_s0, %s1098_s29  ;;  %p1102_p3 = scmp.lt.u32.totalorder %s1098_s29, %s1433_s0 }
  0x2a   :  { %p1104_p4 = pnand %p1102_p3, %p1099_p2 }
  0x2c   :  { %1107 = shalt.err (!%p1104_p4)
}
  0x2d   :  { %s1108_s17 = scalar_lea.vmem %s28_s15, 64  ;;  %p1113_p6 = scmp.lt.s32.totalorder %s28_s15, %s28_s15 }
  0x2e   :  { %p1109_p5 = scmp.ne.s32.totalorder %s28_s15, %s1108_s17  ;;  %p1114_p7 = scmp.lt.s32.totalorder %s1108_s17, %s1108_s17 }
  0x30   :  { %p1115_p8 = por %p1114_p7, %p1113_p6 }
  0x32   :  { %p1116_p9 = pnand %p1115_p8, %p1109_p5 }
  0x34   :  { %1119 = shalt.err (!%p1116_p9)
}
  0x35   :  { %30 = dma.hbm_to_vmem [thread:$0]  %s1433_s0, 64, %s28_s15, [#allocation3]  }
  0x36   :  { %s1225_s19 = smov [#allocation7]   ;;  %s1226_s21 = smov [#allocation10]  }
  0x37   :  { %s50_s20 = sshll.u32 %s1225_s19, 4  ;;  %s78_s22 = sshll.u32 %s1226_s21, 4  ;;  %s51_s20 = int_to_ptr.vmem [resolvable:$true] %s50_s20  ;;  %s79_s22 = int_to_ptr.vmem [resolvable:$true] %s78_s22 }
  0x38   :  { %s1120_s25 = scalar_lea.hbm %s1436_s3, 2048 }
  0x39   :  { %p1121_p10 = scmp.ne.s32.totalorder %s1436_s3, %s1120_s25  ;;  %p1124_p11 = scmp.lt.u32.totalorder %s1120_s25, %s1436_s3 }
  0x3b   :  { %p1126_p12 = pnand %p1124_p11, %p1121_p10 }
  0x3d   :  { %1129 = shalt.err (!%p1126_p12)
}
  0x3e   :  { %s1130_s0 = scalar_lea.vmem %s51_s20, 2048  ;;  %p1135_p0 = scmp.lt.s32.totalorder %s51_s20, %s51_s20 }
  0x3f   :  { %p1131_p13 = scmp.ne.s32.totalorder %s51_s20, %s1130_s0  ;;  %p1136_p1 = scmp.lt.s32.totalorder %s1130_s0, %s1130_s0 }
  0x41   :  { %p1137_p2 = por %p1136_p1, %p1135_p0 }
  0x43   :  { %p1138_p3 = pnand %p1137_p2, %p1131_p13 }
  0x45   :  { %1141 = shalt.err (!%p1138_p3)
}
  0x46   :  { %56 = dma.hbm_to_vmem [thread:$0]  %s1436_s3, 2048, %s51_s20, [#allocation6], %s1223_s18, %s1223_s18, %s1224_s24  }
  0x47   :  { %s1142_s16 = scalar_lea.hbm %s1440_s7, 1024 }
  0x48   :  { %p1143_p4 = scmp.ne.s32.totalorder %s1440_s7, %s1142_s16  ;;  %p1146_p5 = scmp.lt.u32.totalorder %s1142_s16, %s1440_s7 }
  0x4a   :  { %p1148_p6 = pnand %p1146_p5, %p1143_p4 }
  0x4c   :  { %1151 = shalt.err (!%p1148_p6)
}
  0x4d   :  { %s1152_s21 = scalar_lea.vmem %s79_s22, 1024  ;;  %p1157_p8 = scmp.lt.s32.totalorder %s79_s22, %s79_s22 }
  0x4e   :  { %p1153_p7 = scmp.ne.s32.totalorder %s79_s22, %s1152_s21  ;;  %p1158_p9 = scmp.lt.s32.totalorder %s1152_s21, %s1152_s21 }
  0x50   :  { %p1159_p10 = por %p1158_p9, %p1157_p8 }
  0x52   :  { %p1160_p11 = pnand %p1159_p10, %p1153_p7 }
  0x54   :  { %1163 = shalt.err (!%p1160_p11)
}
  0x55   :  { %84 = dma.hbm_to_vmem [thread:$0]  %s1440_s7, 1024, %s79_s22, [#allocation9], %s1223_s18, %s1223_s18, %s1224_s24  }
  0x56   :  { %s1227_s23 = smov [#allocation11]   ;;  %s1164_s27 = scalar_lea.hbm %s1442_s9, 1024 }
  0x57   :  { %s92_s1 = sshll.u32 %s1227_s23, 4  ;;  %p1165_p12 = scmp.ne.s32.totalorder %s1442_s9, %s1164_s27  ;;  %s93_s1 = int_to_ptr.vmem [resolvable:$true] %s92_s1 }
  0x58   :  { %p1168_p13 = scmp.lt.u32.totalorder %s1164_s27, %s1442_s9 }
  0x5a   :  { %p1170_p0 = pnand %p1168_p13, %p1165_p12 }
  0x5c   :  { %1173 = shalt.err (!%p1170_p0)
}
  0x5d   :  { %s1174_s30 = scalar_lea.vmem %s93_s1, 1024  ;;  %p1179_p2 = scmp.lt.s32.totalorder %s93_s1, %s93_s1 }
  0x5e   :  { %p1175_p1 = scmp.ne.s32.totalorder %s93_s1, %s1174_s30  ;;  %p1180_p3 = scmp.lt.s32.totalorder %s1174_s30, %s1174_s30 }
  0x60   :  { %p1181_p4 = por %p1180_p3, %p1179_p2 }
  0x62   :  { %p1182_p5 = pnand %p1181_p4, %p1175_p1 }
  0x64   :  { %1185 = shalt.err (!%p1182_p5)
}
  0x65   :  { %98 = dma.hbm_to_vmem [thread:$0]  %s1442_s9, 1024, %s93_s1, [#allocation12], %s1223_s18, %s1223_s18, %s1224_s24  }
  0x66   :  { %1208 = dma.done.wait [#allocation3], 64  }
  0x67   :  { %1209 = vsyncadd [#allocation3], 4294967232 }
  0x68   :  { %1210 = dma.done.wait [#allocation6], 4096  }
  0x69   :  { %1211 = vsyncadd [#allocation6], 4294963200 }
  0x6a   :  { %1212 = dma.done.wait [#allocation9], 2048  }
  0x6b   :  { %1213 = vsyncadd [#allocation9], 4294965248 }
  0x6c   :  { %1214 = dma.done.wait [#allocation12], 1024  }
  0x6d   :  { %1215 = vsyncadd [#allocation12], 4294966272  ;;  %v1228_v0 = vmov 0   ;;  %v990_v1 = vld [vmem:[#allocation5 + $0x4] ss:$8 sps:$4 sm:$0xff]   ;;  %v1018_v15 = vld [vmem:[#allocation7 + $0x50] sm:$0xff]   ;;  %v139_v41 = vlaneseq }
  0x6e   :  { %261 = vmatprep.mubr.bf16.mxu0 %v1228_v0  ;;  %v992_v2 = vld [vmem:[#allocation5] ss:$8 sps:$4 sm:$0xff]   ;;  %229 = vmatprep.subr.bf16.mxu0 %v990_v1  ;;  %v993_v3 = vld [vmem:[#allocation5 + $0x14] ss:$8 sps:$4 sm:$0xff]   ;;  %v995_v4 = vld [vmem:[#allocation5 + $0x10] ss:$8 sps:$4 sm:$0xff]  }
  0x6f   :  { %230 = vmatpush1.bf16.msra.mxu0 %v992_v2  ;;  %v996_v5 = vld [vmem:[#allocation5 + $0x24] ss:$8 sps:$4 sm:$0xff]   ;;  %v998_v6 = vld [vmem:[#allocation5 + $0x20] ss:$8 sps:$4 sm:$0xff]   ;;  %v999_v7 = vld [vmem:[#allocation5 + $0x34] ss:$8 sps:$4 sm:$0xff]  }
  0x70   :  { %231 = vmatprep.subr.bf16.mxu0 %v993_v3  ;;  %v1001_v8 = vld [vmem:[#allocation5 + $0x30] ss:$8 sps:$4 sm:$0xff]   ;;  %v1002_v9 = vld [vmem:[#allocation5 + $0x44] ss:$8 sps:$4 sm:$0xff]   ;;  %v1004_v12 = vld [vmem:[#allocation5 + $0x40] ss:$8 sps:$4 sm:$0xff]  }
  0x71   :  { %v1014_v10 = vld [vmem:[#allocation7 + $0x40] sm:$0xff]   ;;  %v1016_v13 = vld [vmem:[#allocation7 + $0x48] sm:$0xff]   ;;  %v1005_v16 = vld [vmem:[#allocation5 + $0x54] ss:$8 sps:$4 sm:$0xff]   ;;  %v1229_v35 = vmov 0.0   ;;  %v140_v42 = vshrl.u32 %v139_v41, 7 }
  0x72   :  { %v1015_v11 = vld [vmem:[#allocation7] sm:$0xff]   ;;  %867 = vmatprep.subr.bf16.mxu1 %v1014_v10  ;;  %v1017_v14 = vld [vmem:[#allocation7 + $0x8] sm:$0xff]   ;;  %v1007_v17 = vld [vmem:[#allocation5 + $0x50] ss:$8 sps:$4 sm:$0xff]   ;;  %vm1230_vm0 = vmmov 0   ;;  %s1231_s5 = smov [#allocation13]  }
  0x73   :  { %232 = vmatpush1.bf16.msra.mxu0 %v995_v4  ;;  %868 = vmatpush3.bf16.msra.mxu1 %v1015_v11  ;;  %v1019_v18 = vld [vmem:[#allocation7 + $0x10] sm:$0xff]   ;;  %v1020_v19 = vld [vmem:[#allocation7 + $0x58] sm:$0xff]   ;;  %v1008_v20 = vld [vmem:[#allocation5 + $0x64] ss:$8 sps:$4 sm:$0xff]   ;;  %v141_v43 = vsub.s32 0, %v140_v42  ;;  %v145_v45 = vsub.s32 1, %v140_v42 }
  0x74   :  { %233 = vmatprep.subr.bf16.mxu0 %v996_v5  ;;  %869 = vmatprep.subr.bf16.mxu1 %v1016_v13  ;;  %v1010_v21 = vld [vmem:[#allocation5 + $0x60] ss:$8 sps:$4 sm:$0xff]   ;;  %v1011_v22 = vld [vmem:[#allocation5 + $0x74] ss:$8 sps:$4 sm:$0xff]   ;;  %v1013_v26 = vld [vmem:[#allocation5 + $0x70] ss:$8 sps:$4 sm:$0xff]  }
  0x75   :  { %v1021_v23 = vld [vmem:[#allocation7 + $0x18] sm:$0xff]   ;;  %v1022_v24 = vld [vmem:[#allocation7 + $0x60] sm:$0xff]   ;;  %v1024_v27 = vld [vmem:[#allocation7 + $0x68] sm:$0xff]   ;;  %s795_s13 = sshll.u32 %s1231_s5, 4  ;;  %s796_s13 = int_to_ptr.vmem [resolvable:$true] %s795_s13 }
  0x76   :  { %v1023_v25 = vld [vmem:[#allocation7 + $0x20] sm:$0xff]   ;;  %v1025_v28 = vld [vmem:[#allocation7 + $0x28] sm:$0xff]   ;;  %v120_v29 = vld [vmem:[#allocation2] sm:$0xf]  ;;  %p1191_p7 = scmp.lt.s32.totalorder %s796_s13, %s796_s13 }
  0x77   :  { %234 = vmatpush1.bf16.msra.mxu0 %v998_v6  ;;  %870 = vmatpush3.bf16.msra.mxu1 %v1017_v14  ;;  %v1026_v30 = vld [vmem:[#allocation7 + $0x70] sm:$0xff]   ;;  %v1028_v32 = vld [vmem:[#allocation7 + $0x78] sm:$0xff]   ;;  %v1030_v34 = vld [vmem:[#allocation8] sm:$0xff]  }
  0x78   :  { %235 = vmatprep.subr.bf16.mxu0 %v999_v7  ;;  %871 = vmatprep.subr.bf16.mxu1 %v1018_v15  ;;  %v1027_v31 = vld [vmem:[#allocation7 + $0x30] sm:$0xff]   ;;  %v1029_v33 = vld [vmem:[#allocation7 + $0x38] sm:$0xff]   ;;  %v1031_v36 = vld [vmem:[#allocation8 + $0x8] sm:$0xff]  }
  0x79   :  { %v1032_v37 = vld [vmem:[#allocation8 + $0x10] sm:$0xff]   ;;  %v1033_v38 = vld [vmem:[#allocation8 + $0x18] sm:$0xff]   ;;  %v1034_v39 = vld [vmem:[#allocation8 + $0x20] sm:$0xff]  }
  0x7a   :  { %v1035_v40 = vld [vmem:[#allocation8 + $0x28] sm:$0xff]   ;;  %v137_v44 = vld [vmem:[%s1435_s2] sm:$0x3]  ;;  %v1036_v58 = vld [vmem:[#allocation8 + $0x30] sm:$0xff]  }
  0x7b   :  { %236 = vmatpush1.bf16.msra.mxu0 %v1001_v8  ;;  %872 = vmatpush3.bf16.msra.mxu1 %v1019_v18  ;;  %v142_v46 = vrot.slane %v137_v44, %v141_v43  ;;  %v146_v47 = vrot.slane %v137_v44, %v145_v45  ;;  %v1037_v59 = vld [vmem:[#allocation8 + $0x38] sm:$0xff]   ;;  %v1038_v60 = vld [vmem:[#allocation10] sm:$0xff]   ;;  %v1039_v61 = vld [vmem:[#allocation10 + $0x8] sm:$0xff]  }
  0x7c   :  { %237 = vmatprep.subr.bf16.mxu0 %v1002_v9  ;;  %873 = vmatprep.subr.bf16.mxu1 %v1020_v19  ;;  %v1040_v62 = vld [vmem:[#allocation10 + $0x10] sm:$0xff]   ;;  %v1041_v63 = vld [vmem:[#allocation10 + $0x18] sm:$0xff]   ;;  %v1042_v0 = vld [vmem:[#allocation10 + $0x20] sm:$0xff]  }
  0x7d   :  { %v1043_v1 = vld [vmem:[#allocation10 + $0x28] sm:$0xff]   ;;  %v823_v3 = vld [vmem:[%s1437_s4] ss:$0 sm:$0xff]  ;;  %v1044_v11 = vld [vmem:[#allocation10 + $0x30] sm:$0xff]  }
  0x7e   :  { %v1046_v13 = vld [vmem:[#allocation11] sm:$0xff]   ;;  %v1047_v14 = vld [vmem:[#allocation11 + $0x8] sm:$0xff]   ;;  %v1048_v15 = vld [vmem:[#allocation11 + $0x10] sm:$0xff]  }
  0x7f   :  { %238 = vmatpush1.bf16.msra.mxu0 %v1004_v12  ;;  %874 = vmatpush3.bf16.msra.mxu1 %v1021_v23  ;;  %v1045_v12 = vld [vmem:[#allocation10 + $0x38] sm:$0xff]   ;;  %v1051_v18 = vld [vmem:[#allocation11 + $0x28] sm:$0xff]  }
  0x80   :  { %239 = vmatprep.subr.bf16.mxu0 %v1005_v16  ;;  %875 = vmatprep.subr.bf16.mxu1 %v1022_v24  ;;  %v1049_v16 = vld [vmem:[#allocation11 + $0x18] sm:$0xff]  }
  0x81   :  { %v840_v19 = vld [vmem:[%s1439_s6] ss:$0 sm:$0xff] }
  0x83   :  { %240 = vmatpush1.bf16.msra.mxu0 %v1007_v17  ;;  %876 = vmatpush3.bf16.msra.mxu1 %v1023_v25  ;;  %v1050_v17 = vld [vmem:[#allocation11 + $0x20] sm:$0xff]  }
  0x84   :  { %241 = vmatprep.subr.bf16.mxu0 %v1008_v20  ;;  %877 = vmatprep.subr.bf16.mxu1 %v1024_v27  ;;  %v1052_v27 = vld [vmem:[#allocation11 + $0x30] sm:$0xff]  }
  0x87   :  { %242 = vmatpush1.bf16.msra.mxu0 %v1010_v21  ;;  %878 = vmatpush3.bf16.msra.mxu1 %v1025_v28  ;;  %v1053_v28 = vld [vmem:[#allocation11 + $0x38] sm:$0xff]  }
  0x88   :  { %243 = vmatprep.subr.bf16.mxu0 %v1011_v22  ;;  %879 = vmatprep.subr.bf16.mxu1 %v1026_v30 }
  0x8b   :  { %244 = vmatpush1.bf16.msra.mxu0 %v1013_v26  ;;  %880 = vmatpush3.bf16.msra.mxu1 %v1027_v31 }
  0x8c   :  { %881 = vmatprep.subr.bf16.mxu1 %v1028_v32  ;;  %916 = vmatprep.subr.bf16.mxu0 %v1229_v35 }
  0x8e   :  { %262 = vmatmul.mubr.bf16.vlgmr.msra.gmra.mrb[0].mxu0 %v120_v29  ;;  %v849_v29 = vld [vmem:[%s1441_s8] ss:$0 sm:$0xff]  ;;  %s1186_s8 = scalar_lea.vmem %s796_s13, 128 }
  0x8f   :  { %882 = vmatpush3.bf16.msra.mxu1 %v1029_v33  ;;  %917 = vmatpush3.bf16.msra.mxu0 %v1030_v34  ;;  %p1187_p6 = scmp.ne.s32.totalorder %s796_s13, %s1186_s8  ;;  %p1192_p8 = scmp.lt.s32.totalorder %s1186_s8, %s1186_s8 }
  0x90   :  { %936 = vmatprep.subr.bf16.mxu1 %v1229_v35  ;;  %918 = vmatprep.subr.bf16.mxu0 %v1229_v35 }
  0x91   :  { %932 = vmatprep.mubr.msk.bf16.mxu0 %vm1230_vm0, %v1229_v35  ;;  %p1193_p9 = por %p1192_p8, %p1191_p7 }
  0x93   :  { %919 = vmatpush3.bf16.msra.mxu0 %v1031_v36  ;;  %p1194_p10 = pnand %p1193_p9, %p1187_p6 }
  0x94   :  { %920 = vmatprep.subr.bf16.mxu0 %v1229_v35 }
  0x97   :  { %921 = vmatpush3.bf16.msra.mxu0 %v1032_v37 }
  0x98   :  { %922 = vmatprep.subr.bf16.mxu0 %v1229_v35 }
  0x9b   :  { %923 = vmatpush3.bf16.msra.mxu0 %v1033_v38  ;;  %v858_v38 = vld [vmem:[%s1443_s10] ss:$0 sm:$0xff] }
  0x9c   :  { %924 = vmatprep.subr.bf16.mxu0 %v1229_v35 }
  0x9f   :  { %925 = vmatpush3.bf16.msra.mxu0 %v1034_v39 }
  0xa0   :  { %926 = vmatprep.subr.bf16.mxu0 %v1229_v35 }
  0xa3   :  { %927 = vmatpush3.bf16.msra.mxu0 %v1035_v40 }
  0xa4   :  { %928 = vmatprep.subr.bf16.mxu0 %v1229_v35 }
  0xa7   :  { %929 = vmatpush3.bf16.msra.mxu0 %v1036_v58 }
  0xa8   :  { %930 = vmatprep.subr.bf16.mxu0 %v1229_v35 }
  0xab   :  { %931 = vmatpush3.bf16.msra.mxu0 %v1037_v59 }
  0xac   :  { %956 = vmatprep.subr.bf16.mxu0 %v1229_v35 }
 0x161   :  { %v263_v48 = vpop.f32.mrb[0].mxu0 }
 0x162   :  { %v264_v49 = vadd.f32 %v263_v48, %v142_v46  ;;  %v265_v50 = vpop.f32.mrb[1].mxu0 }
 0x163   :  { %v266_v51 = vadd.f32 %v265_v50, %v146_v47  ;;  %v267_v52 = vpop.f32.mrb[2].mxu0 }
 0x164   :  { %v270_v53 = vmax.f32 %v264_v49, 0.0  ;;  %v268_v54 = vpop.f32.mrb[3].mxu0 }
 0x165   :  { %v271_v55 = vmax.f32 %v266_v51, 0.0 }
 0x166   :  { %v272_v57 = vpack.c.bf16 %v270_v53, %v270_v53 }
 0x167   :  { %v273_v56 = vpack.c.bf16 %v271_v55, %v271_v55 }
 0x169   :  { %441 = vmatprep.mubr.bf16.mxu1 %v273_v56 }
 0x16a   :  { %442 = vmatmul.mubr.bf16.vlgmr.msra.gmra.mrb[0].mxu1 %v272_v57 }
 0x16b   :  { %952 = vmatprep.mubr.msk.bf16.mxu1 %vm1230_vm0, %v1229_v35  ;;  %937 = vmatpush3.bf16.msra.mxu1 %v1038_v60 }
 0x16c   :  { %938 = vmatprep.subr.bf16.mxu1 %v1229_v35 }
 0x16f   :  { %939 = vmatpush3.bf16.msra.mxu1 %v1039_v61 }
 0x170   :  { %940 = vmatprep.subr.bf16.mxu1 %v1229_v35 }
 0x173   :  { %941 = vmatpush3.bf16.msra.mxu1 %v1040_v62 }
 0x174   :  { %942 = vmatprep.subr.bf16.mxu1 %v1229_v35 }
 0x177   :  { %943 = vmatpush3.bf16.msra.mxu1 %v1041_v63 }
 0x178   :  { %944 = vmatprep.subr.bf16.mxu1 %v1229_v35 }
 0x17b   :  { %945 = vmatpush3.bf16.msra.mxu1 %v1042_v0 }
 0x17c   :  { %946 = vmatprep.subr.bf16.mxu1 %v1229_v35 }
 0x17f   :  { %947 = vmatpush3.bf16.msra.mxu1 %v1043_v1 }
 0x180   :  { %948 = vmatprep.subr.bf16.mxu1 %v1229_v35 }
 0x183   :  { %949 = vmatpush3.bf16.msra.mxu1 %v1044_v11 }
 0x184   :  { %950 = vmatprep.subr.bf16.mxu1 %v1229_v35 }
 0x187   :  { %951 = vmatpush3.bf16.msra.mxu1 %v1045_v12 }
 0x23d   :  { %v883_v2 = vpop.f32.mrb[0].mxu1 }
 0x23e   :  { %v884_v4 = vpop.f32.mrb[1].mxu1 }
 0x23f   :  { %v885_v5 = vadd.f32 %v884_v4, %v883_v2  ;;  %v886_v6 = vpop.f32.mrb[2].mxu1 }
 0x240   :  { %v887_v7 = vpop.f32.mrb[3].mxu1 }
 0x241   :  { %v444_v8 = vadd.f32 %v885_v5, %v823_v3 }
 0x243   :  { %v449_v9 = vmax.f32 %v444_v8, 0.0 }
 0x245   :  { %v450_v10 = vpack.c.bf16 %v449_v9, %v449_v9 }
 0x247   :  { %933 = vmatmul.mubr.bf16.vlgmr.msra.gmra.mrb[4].mxu0 %v450_v10 }
 0x248   :  { %972 = vmatprep.mubr.msk.bf16.mxu0 %vm1230_vm0, %v1229_v35  ;;  %957 = vmatpush3.bf16.msra.mxu0 %v1046_v13 }
 0x249   :  { %958 = vmatprep.subr.bf16.mxu0 %v1229_v35 }
 0x24c   :  { %959 = vmatpush3.bf16.msra.mxu0 %v1047_v14 }
 0x24d   :  { %960 = vmatprep.subr.bf16.mxu0 %v1229_v35 }
 0x250   :  { %961 = vmatpush3.bf16.msra.mxu0 %v1048_v15 }
 0x251   :  { %962 = vmatprep.subr.bf16.mxu0 %v1229_v35 }
 0x254   :  { %963 = vmatpush3.bf16.msra.mxu0 %v1049_v16 }
 0x255   :  { %964 = vmatprep.subr.bf16.mxu0 %v1229_v35 }
 0x258   :  { %965 = vmatpush3.bf16.msra.mxu0 %v1050_v17 }
 0x259   :  { %966 = vmatprep.subr.bf16.mxu0 %v1229_v35 }
 0x25c   :  { %967 = vmatpush3.bf16.msra.mxu0 %v1051_v18 }
 0x25d   :  { %968 = vmatprep.subr.bf16.mxu0 %v1229_v35 }
 0x260   :  { %969 = vmatpush3.bf16.msra.mxu0 %v1052_v27 }
 0x261   :  { %970 = vmatprep.subr.bf16.mxu0 %v1229_v35 }
 0x264   :  { %971 = vmatpush3.bf16.msra.mxu0 %v1053_v28 }
 0x31a   :  { %v556_v20 = vpop.f32.mrb[4].mxu0 }
 0x31b   :  { %v557_v21 = vadd.f32 %v840_v19, %v556_v20  ;;  %v934_v22 = vpop.f32.mrb[5].mxu0 }
 0x31c   :  { %v559_v23 = vpop.f32.mrb[6].mxu0 }
 0x31d   :  { %v562_v24 = vmax.f32 %v557_v21, 0.0  ;;  %v935_v25 = vpop.f32.mrb[7].mxu0 }
 0x31f   :  { %v563_v26 = vpack.c.bf16 %v562_v24, %v562_v24 }
 0x321   :  { %953 = vmatmul.mubr.bf16.vlgmr.msra.gmra.mrb[4].mxu1 %v563_v26 }
 0x3f4   :  { %v669_v30 = vpop.f32.mrb[4].mxu1 }
 0x3f5   :  { %v670_v31 = vadd.f32 %v849_v29, %v669_v30  ;;  %v954_v32 = vpop.f32.mrb[5].mxu1 }
 0x3f6   :  { %v672_v33 = vpop.f32.mrb[6].mxu1 }
 0x3f7   :  { %v675_v34 = vmax.f32 %v670_v31, 0.0  ;;  %v955_v36 = vpop.f32.mrb[7].mxu1 }
 0x3f9   :  { %v676_v37 = vpack.c.bf16 %v675_v34, %v675_v34 }
 0x3fb   :  { %973 = vmatmul.mubr.bf16.vlgmr.msra.gmra.mrb[8].mxu0 %v676_v37 }
 0x4ce   :  { %v782_v35 = vpop.f32.mrb[8].mxu0 }
 0x4cf   :  { %v783_v39 = vadd.f32 %v858_v38, %v782_v35  ;;  %v974_v40 = vpop.f32.mrb[9].mxu0 }
 0x4d0   :  { %v785_v41 = vpop.f32.mrb[10].mxu0 }
 0x4d1   :  { %788 = vst [vmem:[#allocation13] sm:$0xff] %v783_v39  ;;  %v975_v42 = vpop.f32.mrb[11].mxu0 }
 0x4d2   :  { %1197 = shalt.err (!%p1194_p10)
}
 0x4d3   :  { %s1198_s10 = scalar_lea.hbm %s1444_s11, 128 }
 0x4d4   :  { %p1199_p11 = scmp.ne.s32.totalorder %s1444_s11, %s1198_s10  ;;  %p1202_p12 = scmp.lt.u32.totalorder %s1198_s10, %s1444_s11 }
 0x4d6   :  { %p1204_p13 = pnand %p1202_p12, %p1199_p11 }
 0x4d8   :  { %1207 = shalt.err (!%p1204_p13)
}
 0x4d9   :  { %798 = dma.vmem_to_hbm [thread:$0]  %s796_s13, 128, %s1444_s11, [#allocation4]  }
 0x4da   :  { %1216 = dma.done.wait [#allocation4], 128  }
 0x4db   :  { %1217 = vsyncadd [#allocation4], 4294967168 }
 0x4dc   :  { %802 = vsyncpa [#allocation3], 1 }
 0x4dd   :  { %803 = vsyncpa [#allocation6], 1 }
 0x4de   :  { %804 = vsyncpa [#allocation9], 1 }
 0x4df   :  { %805 = vsyncpa [#allocation12], 1 }
 0x4e0   :  { %806 = vsyncpa [#allocation4], 1 }

</bundles_post_ra>
